<compile_context>
chip_gen: v7x
topology: tpu7x:2x2x1
jax: 0.10.0
libtpu: 0.0.40
codegen_flags: <defaults>
</compile_context>

<pallas_src>
import jax
import jax.numpy as jnp
from jax import lax
from jax.experimental import pallas as pl
from jax.experimental.pallas import tpu as pltpu


def _choose_tiling(n, d, itemsize):
    """Pick (tile_rows, tile_d, n_col_tiles): ~1 MiB blocks, >= ~8 row tiles."""
    granule = max(8, 32 // itemsize)            # 8 for f32, 16 for bf16, ...
    target_block_bytes = 1 << 20                # ~1 MiB per input stream per block

    # Column tiling for very wide rows (only when d is 128-aligned).
    if d % 128 == 0 and granule * d * itemsize > target_block_bytes:
        tile_d = 128
    else:
        tile_d = d
    n_col_tiles = d // tile_d

    rows = (target_block_bytes // max(1, tile_d * itemsize)) // granule * granule
    rows = max(granule, rows)

    # Prefer >= ~8 row tiles so a 2-way core split still gets >= 4 pipelined steps.
    min_tiles = 8
    rows_for_tiles = ((((n + min_tiles - 1) // min_tiles) + granule - 1) // granule) * granule
    rows = min(rows, max(granule, rows_for_tiles))
    if n >= granule:
        rows = min(rows, (n // granule) * granule)   # keep block rows <= array rows
    return rows, tile_d, n_col_tiles


def simultaneous_quantiles_loss(inputs, target, qs):
    """Pinball loss, reduction='mean', computed in a Pallas TPU kernel."""
    assert inputs.shape == target.shape, "input/target must have the same shape"

    # Flatten to a 2D (rows, last_dim) view.
    if inputs.ndim <= 1:
        x2 = inputs.reshape(1, -1)
        t2 = target.reshape(1, -1)
    else:
        x2 = inputs.reshape(-1, inputs.shape[-1])
        t2 = target.reshape(-1, inputs.shape[-1])
    n, d = x2.shape
    total = n * d
    # TODO(synk): for tiny / non-128-multiple last dims the blocks are not
    # lane-dense; a flat (rows, 512) repack would recover full DMA efficiency.

    # qs: stream when elementwise; keep VMEM-resident when it is a scalar or a
    # per-last-dim vector; otherwise broadcast & stream (correctness fallback).
    q_resident = None
    q2 = None
    if qs.shape == inputs.shape:
        q2 = qs.reshape(x2.shape)
    elif qs.size == 1:
        q_resident = jnp.broadcast_to(qs.reshape(1, 1).astype(jnp.float32), (1, d))
    elif qs.size == d and qs.shape[-1] == d:
        q_resident = qs.reshape(1, d).astype(jnp.float32)
    else:
        q2 = jnp.broadcast_to(qs, inputs.shape).reshape(x2.shape)

    itemsize = jnp.dtype(x2.dtype).itemsize
    tile_rows, tile_d, n_col_tiles = _choose_tiling(n, d, itemsize)

    n_row_tiles = -(-n // tile_rows)
    n_splits = 2 if n_row_tiles >= 2 else 1      # give v7x's 2nd TC its own slice
    tiles_per_split = -(-n_row_tiles // n_splits)
    last_tile = n_row_tiles - 1

    n_streams = 2 if q_resident is not None else 3
    assert n_streams * 2 * tile_rows * tile_d * itemsize <= 24 * 1024 * 1024, (
        "block working set exceeds VMEM budget")
    # TODO(synk): column-mask tiling for huge last dims that are not 128-multiples.

    # ---- index maps (scalar-prefetch ref is a trailing positional arg) ----
    def stream_map(s, j, i, n_ref):
        t_idx = s * tiles_per_split + i
        return (jnp.minimum(t_idx, last_tile), j)   # clamp phantom tiles (masked in-kernel)

    def resident_map(s, j, i, n_ref):
        return (0, j)

    def out_map(s, j, i, n_ref):
        return (s, j)

    # ---- kernel ----
    def kernel(n_ref, x_ref, t_ref, q_ref, out_ref):
        i = pl.program_id(2)

        @pl.when(i == 0)
        def _zero():
            out_ref[...] = jnp.zeros_like(out_ref)

        xv = x_ref[...].astype(jnp.float32)
        tv = t_ref[...].astype(jnp.float32)
        qv = q_ref[...].astype(jnp.float32)

        diff = xv - tv
        # pinball: ((diff >= 0) - q) * diff == max(diff, 0) - q * diff
        loss = jnp.maximum(diff, 0.0) - qv * diff

        n_valid = n_ref[0]
        row_start = (pl.program_id(0) * tiles_per_split + i) * tile_rows

        # Fold groups of 8 rows with pure vreg-wise adds into the resident
        # (8, tile_d) output block; the cross-sublane/lane reduce is deferred
        # to the wrapper.
        @pl.when(row_start + tile_rows <= n_valid)       # fully-valid tile: fast path
        def _full():
            out_ref[...] += jnp.sum(loss.reshape(tile_rows // 8, 8, tile_d), axis=0)

        @pl.when(row_start + tile_rows > n_valid)        # ragged / phantom tile: mask rows
        def _ragged():
            rows = lax.broadcasted_iota(jnp.int32, loss.shape, 0) + row_start
            masked = jnp.where(rows < n_valid, loss, 0.0)
            out_ref[...] += jnp.sum(masked.reshape(tile_rows // 8, 8, tile_d), axis=0)

    stream_spec = pl.BlockSpec((tile_rows, tile_d), stream_map)
    if q_resident is not None:
        q_arr = q_resident
        q_spec = pl.BlockSpec((1, tile_d), resident_map)
    else:
        q_arr = q2
        q_spec = stream_spec

    n_scalar = jnp.array([n], dtype=jnp.int32)

    partials = pl.pallas_call(
        kernel,
        out_shape=jax.ShapeDtypeStruct((8 * n_splits, d), jnp.float32),
        grid_spec=pltpu.PrefetchScalarGridSpec(
            num_scalar_prefetch=1,
            grid=(n_splits, n_col_tiles, tiles_per_split),
            in_specs=[stream_spec, stream_spec, q_spec],
            out_specs=pl.BlockSpec((8, tile_d), out_map),
        ),
        compiler_params=pltpu.CompilerParams(
            dimension_semantics=("parallel", "parallel", "arbitrary"),
            vmem_limit_bytes=32 * 1024 * 1024,
        ),
        cost_estimate=pl.CostEstimate(
            flops=5 * total,
            transcendentals=0,
            bytes_accessed=n_streams * total * itemsize + 8 * n_splits * d * 4,
        ),
    )(n_scalar, x2, t2, q_arr)

    # Final tiny cross-sublane/lane/split reduce and mean scaling in the wrapper.
    return jnp.sum(partials) * (1.0 / float(total))


def _reference(inputs, target, qs):
    diff = inputs.astype(jnp.float32) - target.astype(jnp.float32)
    threshold = (diff >= 0).astype(jnp.float32) - qs.astype(jnp.float32)
    return jnp.mean(threshold * diff)


if __name__ == "__main__":
    key = jax.random.PRNGKey(0)
    k1, k2, k3 = jax.random.split(key, 3)

    # Small, TPU-friendly shapes: (N, Q) = (128, 128), elementwise qs.
    N, Q = 128, 128
    inputs = jax.random.normal(k1, (N, Q), dtype=jnp.float32)
    target = jax.random.normal(k2, (N, Q), dtype=jnp.float32)
    qs = jax.random.uniform(k3, (N, Q), dtype=jnp.float32)

    loss = simultaneous_quantiles_loss(inputs, target, qs)
    jax.block_until_ready(loss)
    ref = _reference(inputs, target, qs)
    assert jnp.allclose(loss, ref, rtol=1e-4, atol=1e-6), (loss, ref)

    # Ragged row count (exercises the in-kernel mask path; no host-side padding).
    loss2 = simultaneous_quantiles_loss(inputs[:100], target[:100], qs[:100])
    jax.block_until_ready(loss2)
    ref2 = _reference(inputs[:100], target[:100], qs[:100])
    assert jnp.allclose(loss2, ref2, rtol=1e-4, atol=1e-6), (loss2, ref2)

    # Per-quantile vector qs (kept VMEM-resident: 2 HBM streams instead of 3).
    qv = jax.random.uniform(k3, (Q,), dtype=jnp.float32)
    loss3 = simultaneous_quantiles_loss(inputs, target, qv)
    jax.block_until_ready(loss3)
    ref3 = _reference(inputs, target, qv)
    assert jnp.allclose(loss3, ref3, rtol=1e-4, atol=1e-6), (loss3, ref3)

    print("KERNEL_OK")
</pallas_src>

<mosaic_0001>
module attributes {stable_mosaic.version = 11 : i64} {
  func.func @kernel(%arg0: i32, %arg1: i32, %arg2: i32, %arg3: memref<1xi32, #tpu.memory_space<smem>>, %arg4: memref<16x128xf32, #tpu.memory_space<vmem>>, %arg5: memref<16x128xf32, #tpu.memory_space<vmem>>, %arg6: memref<16x128xf32, #tpu.memory_space<vmem>>, %arg7: memref<8x128xf32, #tpu.memory_space<vmem>>) attributes {dimension_semantics = [#tpu.dimension_semantics<parallel>, #tpu.dimension_semantics<parallel>, #tpu.dimension_semantics<arbitrary>], iteration_bounds = array<i64: 2, 1, 4>, scalar_prefetch = 1 : i64, scratch_operands = 0 : i64, tpu.core_type = #tpu.core_type<tc>, window_params = [{transform_indices = @transform_0, window_bounds = array<i64: 16, 128>}, {transform_indices = @transform_1, window_bounds = array<i64: 16, 128>}, {transform_indices = @transform_2, window_bounds = array<i64: 16, 128>}, {transform_indices = @transform_3, window_bounds = array<i64: 8, 128>}]} {
    %c0_i32 = arith.constant 0 : i32
    %0 = arith.cmpi eq, %arg2, %c0_i32 : i32
    %1 = arith.extui %0 : i1 to i32
    %c0_i32_0 = arith.constant 0 : i32
    %2 = arith.cmpi ne, %1, %c0_i32_0 : i32
    scf.if %2 {
      %cst_11 = arith.constant 0.000000e+00 : f32
      %23 = vector.broadcast %cst_11 : f32 to vector<8x128xf32>
      %c0_12 = arith.constant 0 : index
      %c0_13 = arith.constant 0 : index
      %24 = vector.load %arg7[%c0_12, %c0_13] : memref<8x128xf32, #tpu.memory_space<vmem>>, vector<8x128xf32>
      tpu.vector_store %arg7[%c0_12, %c0_13], %23 {strides = array<i32>} : memref<8x128xf32, #tpu.memory_space<vmem>>, vector<8x128xf32>,
    } else {
    }
    %c0 = arith.constant 0 : index
    %c0_1 = arith.constant 0 : index
    %3 = vector.load %arg4[%c0, %c0_1] : memref<16x128xf32, #tpu.memory_space<vmem>>, vector<16x128xf32>
    %c0_2 = arith.constant 0 : index
    %c0_3 = arith.constant 0 : index
    %4 = vector.load %arg5[%c0_2, %c0_3] : memref<16x128xf32, #tpu.memory_space<vmem>>, vector<16x128xf32>
    %c0_4 = arith.constant 0 : index
    %c0_5 = arith.constant 0 : index
    %5 = vector.load %arg6[%c0_4, %c0_5] : memref<16x128xf32, #tpu.memory_space<vmem>>, vector<16x128xf32>
    %6 = arith.subf %3, %4 : vector<16x128xf32>
    %cst = arith.constant 0.000000e+00 : f32
    %7 = vector.broadcast %cst : f32 to vector<16x128xf32>
    %8 = arith.maximumf %6, %7 : vector<16x128xf32>
    %9 = arith.mulf %5, %6 : vector<16x128xf32>
    %10 = arith.subf %8, %9 : vector<16x128xf32>
    %c0_6 = arith.constant 0 : index
    %11 = memref.load %arg3[%c0_6] : memref<1xi32, #tpu.memory_space<smem>>
    %c4_i32 = arith.constant 4 : i32
    %12 = arith.muli %arg0, %c4_i32 : i32
    %13 = arith.addi %12, %arg2 : i32
    %c16_i32 = arith.constant 16 : i32
    %14 = arith.muli %13, %c16_i32 : i32
    %c16_i32_7 = arith.constant 16 : i32
    %15 = arith.addi %14, %c16_i32_7 : i32
    %16 = arith.cmpi sle, %15, %11 : i32
    %17 = arith.extui %16 : i1 to i32
    %c0_i32_8 = arith.constant 0 : i32
    %18 = arith.cmpi ne, %17, %c0_i32_8 : i32
    scf.if %18 {
      %c0_11 = arith.constant 0 : index
      %c0_12 = arith.constant 0 : index
      %23 = vector.load %arg7[%c0_11, %c0_12] : memref<8x128xf32, #tpu.memory_space<vmem>>, vector<8x128xf32>
      %24 = vector.shape_cast %10 : vector<16x128xf32> to vector<2x8x128xf32>
      %cst_13 = arith.constant dense<0.000000e+00> : vector<8x128xf32>
      %25 = vector.multi_reduction <add>, %24, %cst_13 [0] : vector<2x8x128xf32> to vector<8x128xf32>
      %26 = arith.addf %23, %25 : vector<8x128xf32>
      %c0_14 = arith.constant 0 : index
      %c0_15 = arith.constant 0 : index
      %27 = vector.load %arg7[%c0_14, %c0_15] : memref<8x128xf32, #tpu.memory_space<vmem>>, vector<8x128xf32>
      tpu.vector_store %arg7[%c0_14, %c0_15], %26 {strides = array<i32>} : memref<8x128xf32, #tpu.memory_space<vmem>>, vector<8x128xf32>,
    } else {
    }
    %c16_i32_9 = arith.constant 16 : i32
    %19 = arith.addi %14, %c16_i32_9 : i32
    %20 = arith.cmpi sgt, %19, %11 : i32
    %21 = arith.extui %20 : i1 to i32
    %c0_i32_10 = arith.constant 0 : i32
    %22 = arith.cmpi ne, %21, %c0_i32_10 : i32
    scf.if %22 {
      %23 = tpu.iota {dimensions = array<i32: 0>} : vector<16x128xi32>
      %24 = vector.broadcast %14 : i32 to vector<16x128xi32>
      %25 = arith.addi %23, %24 : vector<16x128xi32>
      %26 = vector.broadcast %11 : i32 to vector<16x128xi32>
      %27 = arith.cmpi slt, %25, %26 : vector<16x128xi32>
      %cst_11 = arith.constant 0.000000e+00 : f32
      %28 = vector.broadcast %cst_11 : f32 to vector<16x128xf32>
      %29 = arith.select %27, %10, %28 : vector<16x128xi1>, vector<16x128xf32>
      %c0_12 = arith.constant 0 : index
      %c0_13 = arith.constant 0 : index
      %30 = vector.load %arg7[%c0_12, %c0_13] : memref<8x128xf32, #tpu.memory_space<vmem>>, vector<8x128xf32>
      %31 = vector.shape_cast %29 : vector<16x128xf32> to vector<2x8x128xf32>
      %cst_14 = arith.constant dense<0.000000e+00> : vector<8x128xf32>
      %32 = vector.multi_reduction <add>, %31, %cst_14 [0] : vector<2x8x128xf32> to vector<8x128xf32>
      %33 = arith.addf %30, %32 : vector<8x128xf32>
      %c0_15 = arith.constant 0 : index
      %c0_16 = arith.constant 0 : index
      %34 = vector.load %arg7[%c0_15, %c0_16] : memref<8x128xf32, #tpu.memory_space<vmem>>, vector<8x128xf32>
      tpu.vector_store %arg7[%c0_15, %c0_16], %33 {strides = array<i32>} : memref<8x128xf32, #tpu.memory_space<vmem>>, vector<8x128xf32>,
    } else {
    }
    return
  }
  func.func @transform_0(%arg0: i32, %arg1: i32, %arg2: i32, %arg3: memref<1xi32, #tpu.memory_space<smem>>) -> (i32, i32) {
    %c4_i32 = arith.constant 4 : i32
    %0 = arith.muli %arg0, %c4_i32 : i32
    %1 = arith.addi %0, %arg2 : i32
    %c7_i32 = arith.constant 7 : i32
    %2 = arith.minsi %1, %c7_i32 : i32
    %c0_i32 = arith.constant 0 : i32
    return %2, %arg1 : i32, i32
  }
  func.func @transform_1(%arg0: i32, %arg1: i32, %arg2: i32, %arg3: memref<1xi32, #tpu.memory_space<smem>>) -> (i32, i32) {
    %c4_i32 = arith.constant 4 : i32
    %0 = arith.muli %arg0, %c4_i32 : i32
    %1 = arith.addi %0, %arg2 : i32
    %c7_i32 = arith.constant 7 : i32
    %2 = arith.minsi %1, %c7_i32 : i32
    %c0_i32 = arith.constant 0 : i32
    return %2, %arg1 : i32, i32
  }
  func.func @transform_2(%arg0: i32, %arg1: i32, %arg2: i32, %arg3: memref<1xi32, #tpu.memory_space<smem>>) -> (i32, i32) {
    %c4_i32 = arith.constant 4 : i32
    %0 = arith.muli %arg0, %c4_i32 : i32
    %1 = arith.addi %0, %arg2 : i32
    %c7_i32 = arith.constant 7 : i32
    %2 = arith.minsi %1, %c7_i32 : i32
    %c0_i32 = arith.constant 0 : i32
    return %2, %arg1 : i32, i32
  }
  func.func @transform_3(%arg0: i32, %arg1: i32, %arg2: i32, %arg3: memref<1xi32, #tpu.memory_space<smem>>) -> (i32, i32) {
    %c0_i32 = arith.constant 0 : i32
    return %arg0, %arg1 : i32, i32
  }
}

</mosaic_0001>

<bundles_post_ra>
// kernel: tpu_custom_call.1
= control target key start
LH: loop header
LB: loop body
LE: loop exit
PB: predicated region body
PF: predicated region fallthrough
CT: control target
= control target key end

     0   :  { %s1295_s0 = inlined_call_operand.<no memory space> [shape: s32[1], index: 0, kind: input, shape index: {}]   ;;  %s1296_s1 = inlined_call_operand.hbm [shape: f32[128,128], index: 1, kind: input, shape index: {}]   ;;  %s1297_s2 = inlined_call_operand.hbm [shape: f32[128,128], index: 2, kind: input, shape index: {}]   ;;  %s1298_s3 = inlined_call_operand.hbm [shape: f32[128,128], index: 3, kind: input, shape index: {}]   ;;  %s1299_s4 = inlined_call_operand.hbm [shape: f32[16,128], index: 4, kind: output, shape index: {}]  }
   0x1   :  { %1312 = sst [smem:[#allocation21_spill]] %s1296_s1 }
   0x2   :  { %1313 = sst [smem:[#allocation22_spill]] %s1297_s2 }
   0x3   :  { %9 = sst [smem:[#allocation3]] %s1295_s0 }
   0x4   :  { %10 = vsyncpa [#allocation5], 0 }
   0x5   :  { %12 = vsyncpa [#allocation5 + $0x1], 0 }
   0x6   :  { %13 = vsyncpa [#allocation8], 0 }
   0x7   :  { %15 = vsyncpa [#allocation8 + $0x1], 0 }
   0x8   :  { %16 = vsyncpa [#allocation6], 0 }
   0x9   :  { %18 = vsyncpa [#allocation6 + $0x1], 0  ;;  %s956_s17 = smov 0   ;;  %s958_s18 = smov 0  }
   0xa   :  { %s960_s19 = smov 0   ;;  %s962_s20 = smov 0  }
   0xb   :  { %s964_s21 = smov 0   ;;  %s966_s22 = smov 0  }
   0xc   :  { %s968_s23 = smov 0   ;;  %s970_s0 = smov 0  }
   0xd   :  { %s972_s24 = smov 0   ;;  %s974_s25 = smov 0  }
   0xe   :  { %s976_s26 = smov 0  }
   0xf LB: > { %1314 = sst [smem:[#allocation14_spill]] %s887_s19  ;;  %s1012_s27 = sadd.s32 4294967295, %s919_s26   ;;  %s919_s26 = sphi %s976_s26, %s24_s26   ;;  %s915_s25 = sphi %s974_s25, %s1344_s25   ;;  %s911_s24 = sphi %s972_s24, %s1343_s24   ;;  %s907_s0 = sphi %s970_s0, %s1342_s0   ;;  %s903_s23 = sphi %s968_s23, %s1341_s23   ;;  %s899_s22 = sphi %s966_s22, %s1349_s22   ;;  %s895_s21 = sphi %s964_s21, %s1348_s21   ;;  %s891_s20 = sphi %s962_s20, %s1347_s20   ;;  %s887_s19 = sphi %s960_s19, %s1339_s19   ;;  %s883_s18 = sphi %s958_s18, %s1346_s18   ;;  %s879_s17 = sphi %s956_s17, %s1345_s17  }
  0x10   : > { %1315 = sst [smem:[#allocation15_spill]] %s911_s24  ;;  %s550_s28 = sadd.s32 4294967294, %s919_s26  }
  0x11   : > { %1316 = sst [smem:[#allocation16_spill]] %s915_s25  ;;  %s36_s29 = sadd.s32 1, %s911_s24 }
  0x12   : > { %s43_s30 = sadd.s32 1, %s915_s25  ;;  %p37_p0 = scmp.ge.s32.totalorder %s36_s29, 4 }
  0x13   : > { %s551_s5 = sshll.u32 %s915_s25, 2  ;;  %s60_s7 = sadd.s32 1, %s899_s22 }
  0x14   : > { %s48_s6 = sadd.s32 %s911_s24, %s551_s5  ;;  %s1351_s29 = smov (%p37_p0, %s36_s29), 0 }
  0x15   : > { %1317 = sst [smem:[#allocation17_spill]] %s1351_s29  ;;  %s1353_s30 = smov (!%p37_p0, %s43_s30), %s915_s25 }
  0x16   : > { %p49_p1 = scmp.lt.s32.totalorder %s48_s6, 7  ;;  %p67_p2 = scmp.ne.s32.totalorder %s899_s22, %s895_s21 }
  0x17   : > { %p45_p3 = scmp.ge.s32.totalorder %s1353_s30, 2  ;;  %p68_p4 = scmp.eq.s32.totalorder %s919_s26, 0 }
  0x18   : > { %s1355_s6 = smov (!%p49_p1, %s48_s6), 7  ;;  %p73_p6 = scmp.ne.s32.totalorder %s895_s21, %s891_s20 }
  0x19   : > { %s1357_s30 = smov (%p45_p3, %s1353_s30), 0  ;;  %p1028_p5 = por %p68_p4, %p67_p2 }
  0x1a   : > { %1318 = sst [smem:[#allocation18_spill]] %s1357_s30  ;;  %s552_s9 = sshll.u32 %s1357_s30, 2 }
  0x1b   : > { %p74_p7 = scmp.eq.s32.totalorder %s1012_s27, 0  ;;  %s52_s10 = sadd.s32 %s552_s9, %s1351_s29 }
  0x1c   : > { %s155_s11 = ssub.s32 %s915_s25, %s1357_s30  ;;  %p53_p8 = scmp.lt.s32.totalorder %s52_s10, 7 }
  0x1d   : > { %p1039_p9 = por %p74_p7, %p73_p6  ;;  %p158_p10 = scmp.eq.s32.totalorder %s155_s11, 0 }
  0x1e   : > { %s160_s13 = sadd.s32 1, %s887_s19  ;;  %s1359_s10 = smov (!%p53_p8, %s52_s10), 7 }
  0x1f   : > { %s1320_s12 = scalar_select %p1039_p9, 1, 0 }
  0x20   : > { %s1045_s14 = scalar_select %p158_p10, %s887_s19, %s160_s13  }
  0x21   : > { %s55_s15 = ssub.s32 %s1355_s6, %s1359_s10  ;;  %p170_p11 = scmp.ne.s32.totalorder %s887_s19, %s883_s18 }
  0x22   : > { %1321 = sst [smem:[#allocation19_spill]] %s1045_s14  ;;  %p58_p12 = scmp.eq.s32.totalorder %s55_s15, 0 }
  0x23   : > { %p171_p13 = scmp.eq.s32.totalorder %s1012_s27, 7  ;;  %p176_p0 = scmp.ne.s32.totalorder %s883_s18, %s879_s17 }
  0x24   : > { %p177_p1 = scmp.eq.s32.totalorder %s550_s28, 7  ;;  %p610_p4 = scmp.lt.s32.totalorder %s919_s26, 8 }
  0x25   : > { %s1055_s16 = scalar_select %p58_p12, %s899_s22, %s60_s7  }
  0x26   : > { %p1057_p2 = por %p171_p13, %p170_p11  ;;  %p1061_p3 = por %p177_p1, %p176_p0 }
  0x27   : > { %1322 = sst [smem:[#allocation20_spill]] %s1055_s16  ;;  %s1301_s9 = sand.u32 1, %s899_s22  }
  0x28   : > { %s1323_s20 = scalar_select %p1057_p2, 1, 0 }
  0x29   : > { %s1324_s5 = scalar_select %p1061_p3, 1, 0 }
  0x2a   : > { %s1067_s10 = sshll.u32 %s1355_s6, 8  ;;  %s1071_s11 = sshll.u32 %s1301_s9, 4 }
  0x2b   : > { %p1075_p6 = pnand %p610_p4, %p1028_p5  ;;  %s223_s7 = sand.u32 1, %s919_s26  }
  0x2c   : > { %s1326_s2 = sld [smem:[#allocation22_spill]]  ;;  %s227_s6 = scalar_lea.vmem [#allocation7], %s1071_s11 }
  0x2d   : > { %s239_s9 = sshll.u32 %s227_s6, 4  ;;  %s1090_s8 = scalar_lea.sflag [#allocation8], %s223_s7  ;;  %s1087_s9 = int_to_ptr.vmem [resolvable:$true] %s239_s9 }
  0x2e   : > { %p1096_p8 = pneg %p1075_p6 }
  0x32   : > { %s1084_s30 = scalar_lea.hbm %s1326_s2, %s1067_s10  ;;  %s708_s6 = scalar_lea.hbm %s1326_s2, 2048 }
  0x33   : > { %s703_s29 = scalar_lea.hbm %s1084_s30, 256  ;;  %p709_p12 = scmp.lt.u32.totalorder %s1084_s30, %s1326_s2 }
  0x34   : > { %p704_p5 = scmp.ne.s32.totalorder %s1084_s30, %s703_s29  ;;  %p710_p13 = scmp.lt.u32.totalorder %s708_s6, %s703_s29 }
  0x35   : > { %p712_p1 = scmp.lt.u32.totalorder %s703_s29, %s1084_s30 }
  0x36   : > { %p706_p10 = pnand %p1096_p8, %p704_p5  ;;  %p711_p0 = por %p710_p13, %p709_p12 }
  0x38   : > { %p707_p11 = pneg %p706_p10  ;;  %p713_p4 = por %p712_p1, %p711_p0 }
  0x3a   : > { %p714_p7 = pnand %p713_p4, %p707_p11 }
  0x3c   : > { %717 = shalt.err (!%p714_p7)
}
  0x3d   : > { %s718_s7 = scalar_lea.vmem %s1087_s9, 256  ;;  %s921_s13 = smov [#allocation7]  }
  0x3e   : > { %p719_p5 = scmp.ne.s32.totalorder %s1087_s9, %s718_s7  ;;  %s723_s15 = sshll.u32 %s921_s13, 4  ;;  %s724_s15 = int_to_ptr.vmem [resolvable:$false] %s723_s15 }
  0x3f   : > { %s725_s24 = scalar_lea.vmem %s724_s15, 512  ;;  %p726_p2 = scmp.lt.s32.totalorder %s1087_s9, %s724_s15 }
  0x40   : > { %p721_p10 = pnand %p719_p5, %p1096_p8  ;;  %p727_p9 = scmp.lt.s32.totalorder %s725_s24, %s718_s7 }
  0x42   : > { %p722_p3 = pneg %p721_p10  ;;  %p728_p12 = por %p727_p9, %p726_p2 }
  0x44   : > { %p729_p13 = pnand %p728_p12, %p722_p3 }
  0x46   : > { %732 = shalt.err (!%p729_p13)
}
  0x47   : > { %s1307_s29 = smov 128   ;;  %s1309_s16 = smov 8  }
  0x48   : > { %602 = dma.hbm_to_vmem [thread:$0]  (!%p1075_p6), %s1084_s30, 256, %s1087_s9, %s1090_s8, %s1307_s29, %s1307_s29, %s1309_s16  }
  0x49   : > { %p273_p9 = scmp.lt.s32.totalorder %s919_s26, 9  ;;  %p1328_p2 = scmp.ge.s32.totalorder %s919_s26, 1 }
  0x4a   : > { %s1330_s1 = sld [smem:[#allocation21_spill]]  ;;  %s201_s24 = scalar_lea.vmem [#allocation4], %s1071_s11 }
  0x4b   : > { %p1126_p3 = pnand %p1328_p2, %p273_p9  ;;  %s213_s2 = sshll.u32 %s201_s24, 4  ;;  %s1137_s2 = int_to_ptr.vmem [resolvable:$true] %s213_s2 }
  0x4c   : > { %s1331_s30 = sand.u32 1, %s899_s22  }
  0x4d   : > { %s1329_s6 = scalar_select %p1126_p3, 1, 0 }
  0x4e   : > { %s1141_s9 = scalar_lea.sflag [#allocation5], %s1331_s30 }
  0x50   : > { %s1134_s15 = scalar_lea.hbm %s1330_s1, %s1067_s10  ;;  %s738_s13 = scalar_lea.hbm %s1330_s1, 2048 }
  0x51   : > { %s733_s29 = scalar_lea.hbm %s1134_s15, 256  ;;  %p739_p1 = scmp.lt.u32.totalorder %s1134_s15, %s1330_s1 }
  0x52   : > { %p734_p7 = scmp.ne.s32.totalorder %s1134_s15, %s733_s29  ;;  %p740_p4 = scmp.lt.u32.totalorder %s738_s13, %s733_s29 }
  0x53   : > { %p742_p10 = scmp.lt.u32.totalorder %s733_s29, %s1134_s15 }
  0x54   : > { %p736_p11 = pnand %p734_p7, %p1096_p8  ;;  %p741_p5 = por %p740_p4, %p739_p1 }
  0x56   : > { %p737_p0 = pneg %p736_p11  ;;  %p743_p12 = por %p742_p10, %p741_p5 }
  0x58   : > { %p744_p13 = pnand %p743_p12, %p737_p0 }
  0x5a   : > { %747 = shalt.err (!%p744_p13)
}
  0x5b   : > { %s748_s24 = scalar_lea.vmem %s1137_s2, 256  ;;  %s924_s16 = smov [#allocation4]  }
  0x5c   : > { %p749_p9 = scmp.ne.s32.totalorder %s1137_s2, %s748_s24  ;;  %s753_s30 = sshll.u32 %s924_s16, 4  ;;  %s754_s30 = int_to_ptr.vmem [resolvable:$false] %s753_s30 }
  0x5d   : > { %s755_s19 = scalar_lea.vmem %s754_s30, 512  ;;  %p756_p11 = scmp.lt.s32.totalorder %s1137_s2, %s754_s30 }
  0x5e   : > { %p751_p2 = pnand %p749_p9, %p1096_p8  ;;  %p757_p3 = scmp.lt.s32.totalorder %s755_s19, %s748_s24 }
  0x60   : > { %p752_p7 = pneg %p751_p2  ;;  %p758_p1 = por %p757_p3, %p756_p11 }
  0x62   : > { %p759_p4 = pnand %p758_p1, %p752_p7 }
  0x64   : > { %762 = shalt.err (!%p759_p4)
}
  0x65   : > { %s1332_s14 = smov 8   ;;  %s1333_s29 = smov 128  }
  0x66   : > { %599 = dma.hbm_to_vmem [thread:$0]  (!%p1075_p6), %s1134_s15, 256, %s1137_s2, %s1141_s9, %s1333_s29, %s1333_s29, %s1332_s14  }
  0x67   : > { %s1172_s16 = scalar_lea.hbm %s1298_s3, %s1067_s10  ;;  %s253_s24 = scalar_lea.vmem [#allocation9], %s1071_s11 }
  0x68   : > { %s265_s30 = sshll.u32 %s253_s24, 4  ;;  %s763_s19 = scalar_lea.hbm %s1172_s16, 256  ;;  %s1175_s30 = int_to_ptr.vmem [resolvable:$true] %s265_s30 }
  0x69   : > { %p764_p3 = scmp.ne.s32.totalorder %s1172_s16, %s763_s19  ;;  %s768_s15 = scalar_lea.hbm %s1298_s3, 2048 }
  0x6a   : > { %p769_p10 = scmp.lt.u32.totalorder %s1172_s16, %s1298_s3  ;;  %p770_p12 = scmp.lt.u32.totalorder %s768_s15, %s763_s19 }
  0x6b   : > { %p766_p0 = pnand %p764_p3, %p1096_p8  ;;  %p772_p9 = scmp.lt.u32.totalorder %s763_s19, %s1172_s16 }
  0x6c   : > { %p771_p13 = por %p770_p12, %p769_p10 }
  0x6d   : > { %p767_p5 = pneg %p766_p0 }
  0x6e   : > { %p773_p2 = por %p772_p9, %p771_p13 }
  0x70   : > { %p774_p7 = pnand %p773_p2, %p767_p5 }
  0x72   : > { %777 = shalt.err (!%p774_p7)
}
  0x73   : > { %s778_s11 = scalar_lea.vmem %s1175_s30, 256  ;;  %s925_s1 = smov [#allocation9]  }
  0x74   : > { %p779_p11 = scmp.ne.s32.totalorder %s1175_s30, %s778_s11  ;;  %s783_s7 = sshll.u32 %s925_s1, 4  ;;  %s784_s7 = int_to_ptr.vmem [resolvable:$false] %s783_s7 }
  0x75   : > { %s785_s13 = scalar_lea.vmem %s784_s7, 512  ;;  %p786_p3 = scmp.lt.s32.totalorder %s1175_s30, %s784_s7 }
  0x76   : > { %p781_p1 = pnand %p779_p11, %p1096_p8  ;;  %p787_p0 = scmp.lt.s32.totalorder %s785_s13, %s778_s11 }
  0x78   : > { %p782_p4 = pneg %p781_p1  ;;  %p788_p10 = por %p787_p0, %p786_p3 }
  0x7a   : > { %p789_p12 = pnand %p788_p10, %p782_p4 }
  0x7c   : > { %792 = shalt.err (!%p789_p12)
}
  0x7d   : > { %605 = dma.hbm_to_vmem [thread:$0]  (!%p1075_p6), %s1172_s16, 256, %s1175_s30, %s1090_s8, %s1333_s29, %s1333_s29, %s1332_s14  }
  0x7e   : > { %p1334_p8 = scmp.ne.s32.totalorder %s1329_s6, 0 }
  0x7f   : > { %s279_s25 = sand.u32 (!%p1334_p8), 1, %s895_s21   ;;  %p1335_p5 = scmp.ne.s32.totalorder (!%p1334_p8), %s1320_s12, 0 }
  0x80   : > { %277 = sbr.rel (%p1334_p8) target bundleno = 205 (0xcd), region = 32  ;;  %s572_s24 = sshll.u32 (!%p1334_p8), %s279_s25, 4 }
  0x81   : > { %s280_s19 = scalar_lea.sflag (!%p1334_p8), [#allocation5], %s279_s25  ;;  %s283_s2 = scalar_lea.vmem (!%p1334_p8), [#allocation4], %s572_s24 }
  0x87   : > { %866 = dma.done.wait (%p1335_p5), %s280_s19, 256  }
  0x88   : > { %868 = vsyncadd (%p1335_p5), %s280_s19, 4294967040  ;;  %s288_s28 = sand.u32 1, %s1012_s27   ;;  %s292_s9 = scalar_lea.vmem [#allocation7], %s572_s24 }
  0x89   : > { %s289_s15 = scalar_lea.sflag [#allocation8], %s288_s28 }
  0x8a   : > { %870 = dma.done.wait (%p1335_p5), %s289_s15, 512  }
  0x8b   : > { %872 = vsyncadd (%p1335_p5), %s289_s15, 4294966784  ;;  %s331_s8 = sand.u32 1, %s883_s18   ;;  %s301_s14 = scalar_lea.vmem [#allocation9], %s572_s24 }
  0x8c   : > { %s575_s6 = sshll.u32 %s331_s8, 3  ;;  %p576_p6 = scmp.ne.s32.totalorder %s903_s23, 0 }
  0x8d   : > { %s1217_s29 = scalar_lea.vmem [#allocation10], %s575_s6  ;;  %v926_v0 = vmov (!%p576_p6), 0.0  }
  0x8e   : > { %352 = sbr.rel (%p576_p6) target bundleno = 149 (0x95), region = 48  ;;  %353 = vst [vmem:[%s1217_s29] sm:$0xff] (!%p576_p6), %v926_v0 }
  0x95 PF: > { %v354_v1 = vld [vmem:[%s283_s2] sm:$0xff]  ;;  %v355_v2 = vld [vmem:[%s283_s2 + $0x8] sm:$0xff]  ;;  %s1221_s27 = sld [smem:[#allocation3]]  ;;  %s577_s12 = sshll.u32 %s907_s0, 2 }
  0x96   : > { %v356_v3 = vld [vmem:[%s292_s9] sm:$0xff]  ;;  %v357_v4 = vld [vmem:[%s292_s9 + $0x8] sm:$0xff]  ;;  %s370_s16 = sadd.s32 %s903_s23, %s577_s12 }
  0x97   : > { %v358_v5 = vld [vmem:[%s301_s14] sm:$0xff]  ;;  %v359_v6 = vld [vmem:[%s301_s14 + $0x8] sm:$0xff]  ;;  %v360_v7 = vsub.f32 %v354_v1, %v356_v3  ;;  %v361_v8 = vsub.f32 %v355_v2, %v357_v4  ;;  %s578_s30 = sshll.u32 %s370_s16, 4 }
  0x98   : > { %s372_s10 = sadd.s32 16, %s578_s30 }
  0x99   : > { %v362_v9 = vmax.f32 %v360_v7, 0.0  ;;  %v364_v10 = vmul.f32 %v360_v7, %v358_v5  ;;  %v363_v11 = vmax.f32 %v361_v8, 0.0  ;;  %v365_v12 = vmul.f32 %v361_v8, %v359_v6 }
  0x9b   : > { %v366_v13 = vsub.f32 %v362_v9, %v364_v10  ;;  %v367_v14 = vsub.f32 %v363_v11, %v365_v12  ;;  %p579_p13 = scmp.gt.s32.totalorder %s372_s10, %s1221_s27 }
  0x9c   : > { %v377_v15 = vld [vmem:[%s1217_s29] sm:$0xff] (!%p579_p13) }
  0x9d   : > { %376 = sbr.rel (%p579_p13) target bundleno = 164 (0xa4), region = 52  ;;  %v378_v16 = vadd.f32 (!%p579_p13), %v367_v14, %v366_v13 }
  0x9f   : > { %v379_v17 = vadd.f32 (!%p579_p13), %v378_v16, %v377_v15 }
  0xa1   : > { %380 = vst [vmem:[%s1217_s29] sm:$0xff] (!%p579_p13), %v379_v17 }
  0xa4 PF: > { %p580_p9 = scmp.le.s32.totalorder %s372_s10, %s1221_s27 }
  0xa5   : > { %v385_v18 = vlaneseq (!%p580_p9)  ;;  %v388_v19 = vstv (!%p580_p9), %s578_s30  ;;  %v391_v21 = vstv (!%p580_p9), %s1221_s27 }
  0xa6   : > { %384 = sbr.rel (%p580_p9) target bundleno = 180 (0xb4), region = 56 }
  0xa7   : > { %v386_v20 = vshrl.u32 (!%p580_p9), %v385_v18, 7 }
  0xa8   : > { %v396_v27 = vld [vmem:[%s1217_s29] sm:$0xff] (!%p580_p9) }
  0xa9   : > { %v387_v22 = vadd.s32 (!%p580_p9), 8, %v386_v20  ;;  %v389_v23 = vadd.s32 (!%p580_p9), %v388_v19, %v386_v20 }
  0xab   : > { %v390_v24 = vadd.s32 (!%p580_p9), %v388_v19, %v387_v22  ;;  %vm392_vm0 = vcmp.lt.s32.totalorder (!%p580_p9), %v389_v23, %v391_v21 }
  0xac   : > { %v394_v25 = vsel (!%p580_p9), %vm392_vm0, %v366_v13, 0.0 }
  0xad   : > { %vm393_vm1 = vcmp.lt.s32.totalorder %v390_v24, %v391_v21 }
  0xae   : > { %v395_v26 = vsel %vm393_vm1, %v367_v14, 0.0 }
  0xaf   : > { %v397_v28 = vadd.f32 %v395_v26, %v394_v25 }
  0xb1   : > { %v398_v29 = vadd.f32 %v397_v28, %v396_v27 }
  0xb3   : > { %399 = vst [vmem:[%s1217_s29] sm:$0xff] %v398_v29 }
  0xb4 PF: > { %s582_s23 = sshll.u32 %s907_s0, 7  ;;  %s415_s13 = sshll.u32 %s1217_s29, 4  ;;  %s416_s13 = int_to_ptr.vmem [resolvable:$true] %s415_s13 }
  0xb5   : > { %s1236_s7 = scalar_lea.hbm %s1299_s4, %s582_s23  ;;  %s401_s25 = scalar_lea.sflag [#allocation6], %s331_s8 }
  0xb6   : > { %s793_s24 = scalar_lea.vmem %s416_s13, 128  ;;  %p1336_p7 = scmp.ne.s32.totalorder %s1323_s20, 0 }
  0xb7   : > { %p794_p2 = scmp.ne.s32.totalorder %s416_s13, %s793_s24  ;;  %s927_s19 = smov [#allocation10]  }
  0xb8   : > { %s797_s2 = sshll.u32 %s927_s19, 4  ;;  %s798_s2 = int_to_ptr.vmem [resolvable:$false] %s797_s2 }
  0xb9   : > { %p795_p11 = pnand %p794_p2, %p1336_p7  ;;  %s799_s28 = scalar_lea.vmem %s798_s2, 256 }
  0xba   : > { %p800_p4 = scmp.lt.s32.totalorder %s416_s13, %s798_s2  ;;  %p801_p3 = scmp.lt.s32.totalorder %s799_s28, %s793_s24 }
  0xbb   : > { %p796_p1 = pneg %p795_p11 }
  0xbc   : > { %p802_p0 = por %p801_p3, %p800_p4 }
  0xbe   : > { %p803_p10 = pnand %p802_p0, %p796_p1 }
  0xc0   : > { %806 = shalt.err (!%p803_p10)
}
  0xc1   : > { %s807_s0 = scalar_lea.hbm %s1236_s7, 128  ;;  %s811_s8 = scalar_lea.hbm %s1299_s4, 256 }
  0xc2   : > { %p808_p12 = scmp.ne.s32.totalorder %s1236_s7, %s807_s0  ;;  %p812_p6 = scmp.lt.u32.totalorder %s1236_s7, %s1299_s4 }
  0xc3   : > { %p813_p13 = scmp.lt.u32.totalorder %s811_s8, %s807_s0  ;;  %p815_p2 = scmp.lt.u32.totalorder %s807_s0, %s1236_s7 }
  0xc4   : > { %p809_p8 = pnand %p808_p12, %p1336_p7 }
  0xc5   : > { %p814_p9 = por %p813_p13, %p812_p6 }
  0xc6   : > { %p810_p5 = pneg %p809_p8 }
  0xc7   : > { %p816_p11 = por %p815_p2, %p814_p9 }
  0xc9   : > { %p817_p1 = pnand %p816_p11, %p810_p5 }
  0xcb   : > { %820 = shalt.err (!%p817_p1)
}
  0xcc   : > { %594 = dma.vmem_to_hbm [thread:$0]  (%p1336_p7), %s416_s13, 128, %s1236_s7, %s401_s25  }
  0xcd PF: > { %p611_p4 = scmp.ge.s32.totalorder %s919_s26, 2  ;;  %s427_s29 = sand.u32 1, %s879_s17  }
  0xce   : > { %p1337_p3 = scmp.ne.s32.totalorder %s1324_s5, 0  ;;  %s428_s27 = scalar_lea.sflag [#allocation6], %s427_s29 }
  0xd0   : > { %p607_p0 = pnand %p611_p4, %p1337_p3 }
  0xd2   : > { %874 = dma.done.wait (!%p607_p0), %s428_s27, 128  }
  0xd3   : > { %876 = vsyncadd (!%p607_p0), %s428_s27, 4294967168  ;;  %s24_s26 = sadd.s32 1, %s919_s26   ;;  %s1338_s12 = sld [smem:[#allocation14_spill]] }
  0xd4   : > { %p21_p10 = scmp.ge.s32.totalorder %s24_s26, 10   ;;  %s1339_s19 = sld [smem:[#allocation19_spill]] }
  0xd5   : > { %s1340_s16 = sld [smem:[#allocation20_spill]]  ;;  %s1341_s23 = sld [smem:[#allocation15_spill]] }
  0xd6   : > { %s1342_s0 = sld [smem:[#allocation16_spill]]  ;;  %s1343_s24 = sld [smem:[#allocation17_spill]] }
  0xd7   : > { %s1344_s25 = sld [smem:[#allocation18_spill]]  ;;  %s1345_s17 = smov %s883_s18 }
  0xd8   : > { %s1347_s20 = smov %s895_s21  ;;  %s1348_s21 = smov %s899_s22 }
  0xd9   : > { %s1346_s18 = smov %s1338_s12  ;;  %23 = sbr.rel (!%p21_p10) target bundleno = 15 (0xf), region = 113 }
  0xdb   : > { %s1349_s22 = smov %s1340_s16 }
  0xe0   :  { %433 = vsyncpa [#allocation5], 1 }
  0xe1   :  { %435 = vsyncpa [#allocation5 + $0x1], 1 }
  0xe2   :  { %436 = vsyncpa [#allocation8], 1 }
  0xe3   :  { %438 = vsyncpa [#allocation8 + $0x1], 1 }
  0xe4   :  { %439 = vsyncpa [#allocation6], 1 }
  0xe5   :  { %441 = vsyncpa [#allocation6 + $0x1], 1 }

</bundles_post_ra>
